<compile_context>
chip_gen: v7x
topology: tpu7x:2x2x1
jax: 0.10.0
libtpu: 0.0.40
codegen_flags: <defaults>
</compile_context>

<pallas_src>
import jax
import jax.numpy as jnp
from jax.experimental import pallas as pl
from jax.experimental.pallas import tpu as pltpu

LANE = 128
VMEM_LIMIT = 32 * 1024 * 1024


def _round_up(v, m):
    return ((v + m - 1) // m) * m


def _plan_tiles(n):
    """Choose (npad, tm, tk) with npad % tm == 0 and npad % tk == 0."""
    if n <= 1024:
        npad = _round_up(n, LANE)
        tk = npad                                  # single reduction step
        tm = npad // 2 if npad >= 256 else npad    # >=2 row tiles for megacore
    elif n <= 4096:
        npad = _round_up(n, 512)
        tk = npad                                  # full (A+I) row band per step
        tm = 512
    else:
        npad = _round_up(n, 2048)
        tm, tk = 1024, 2048                        # 2 MiB int8 adjacency / step
    return npad, tm, tk


# --------------------------------------------------------------- kernels ---

def transform_kernel(x_ref, w_ref, d_ref, h_ref):
    """Hs_tile = d_tile * (X_tile @ W), stored lane-dense as bf16."""
    h = jnp.dot(x_ref[...], w_ref[...], preferred_element_type=jnp.float32)
    h_ref[...] = (d_ref[...] * h).astype(h_ref.dtype)


def agg_fused_kernel(adj_ref, h_ref, d_ref, b_ref, w2_ref, hs2_ref, acc_ref):
    """Layer-1 aggregate fused with layer-2 transform.

    acc  += bf16(A+I)[i,k] @ Hs1[k]                (f32 accumulation)
    epi:  out1 = d * acc + b1 ;  Hs2 = d * (out1 @ W2)   (bf16 output)
    """
    k = pl.program_id(1)

    @pl.when(k == 0)
    def _():
        acc_ref[...] = jnp.zeros_like(acc_ref)

    a = adj_ref[...].astype(jnp.bfloat16)          # int8 -> bf16 (VPU, hidden)
    acc_ref[...] += jnp.dot(a, h_ref[k], preferred_element_type=jnp.float32)

    @pl.when(k == pl.num_programs(1) - 1)
    def _():
        out1 = d_ref[...] * acc_ref[...] + b_ref[...]
        hs2 = jnp.dot(out1, w2_ref[...], preferred_element_type=jnp.float32)
        # d == 0 on padded rows kills both the bias and the fused transform.
        hs2_ref[...] = (d_ref[...] * hs2).astype(hs2_ref.dtype)


def agg_final_kernel(adj_ref, h_ref, d_ref, b_ref, out_ref, acc_ref):
    """out_tile = d_row * sum_k (A+I)[i,k] @ Hs2[k] + b2   (f32 accumulation)."""
    k = pl.program_id(1)

    @pl.when(k == 0)
    def _():
        acc_ref[...] = jnp.zeros_like(acc_ref)

    a = adj_ref[...].astype(jnp.bfloat16)
    acc_ref[...] += jnp.dot(a, h_ref[k], preferred_element_type=jnp.float32)

    @pl.when(k == pl.num_programs(1) - 1)
    def _():
        out_ref[...] = (d_ref[...] * acc_ref[...] + b_ref[...]).astype(out_ref.dtype)


# -------------------------------------------------------------- wrappers ---

def _transform(x_pad, w_pad, d_col, tm):
    npad, fpad = x_pad.shape
    cp = w_pad.shape[1]
    return pl.pallas_call(
        transform_kernel,
        out_shape=jax.ShapeDtypeStruct((npad, cp), jnp.bfloat16),
        grid_spec=pltpu.PrefetchScalarGridSpec(
            num_scalar_prefetch=0,
            grid=(npad // tm,),
            in_specs=[
                pl.BlockSpec((tm, fpad), lambda i: (i, 0)),
                pl.BlockSpec((fpad, cp), lambda i: (0, 0)),
                pl.BlockSpec((tm, 1), lambda i: (i, 0)),
            ],
            out_specs=pl.BlockSpec((tm, cp), lambda i: (i, 0)),
        ),
        compiler_params=pltpu.CompilerParams(
            dimension_semantics=("parallel",),
            vmem_limit_bytes=VMEM_LIMIT,
        ),
    )(x_pad, w_pad, d_col)


def _aggregate_fused(adj, h3, d_col, b_pad, w2_pad, tm, tk):
    """Hs2 = d * ((d * (A+I) @ Hs1 + b1) @ W2)   -> bf16 [npad, c2p]."""
    npad = adj.shape[0]
    kt, _, c1p = h3.shape
    c2p = w2_pad.shape[1]
    return pl.pallas_call(
        agg_fused_kernel,
        out_shape=jax.ShapeDtypeStruct((npad, c2p), jnp.bfloat16),
        grid_spec=pltpu.PrefetchScalarGridSpec(
            num_scalar_prefetch=0,
            grid=(npad // tm, npad // tk),              # reduction axis last
            in_specs=[
                pl.BlockSpec((tm, tk), lambda i, k: (i, k)),        # int8 adjacency
                pl.BlockSpec((kt, tk, c1p), lambda i, k: (0, 0, 0)),  # Hs1 resident
                pl.BlockSpec((tm, 1), lambda i, k: (i, 0)),          # row d^{-1/2}
                pl.BlockSpec((1, c1p), lambda i, k: (0, 0)),         # bias1
                pl.BlockSpec((c1p, c2p), lambda i, k: (0, 0)),       # W2 (fused)
            ],
            out_specs=pl.BlockSpec((tm, c2p), lambda i, k: (i, 0)),
            scratch_shapes=[pltpu.VMEM((tm, c1p), jnp.float32)],
        ),
        compiler_params=pltpu.CompilerParams(
            dimension_semantics=("parallel", "arbitrary"),
            vmem_limit_bytes=VMEM_LIMIT,
        ),
        cost_estimate=pl.CostEstimate(
            flops=2 * npad * npad * c1p + 2 * npad * c1p * c2p,
            transcendentals=0,
            bytes_accessed=(npad * npad * 1          # int8 adjacency stream
                            + npad * c1p * 2         # Hs1, loaded once (resident)
                            + npad * c2p * 2         # bf16 Hs2 output
                            + npad * 4               # d
                            + c1p * c2p * 4),        # W2
        ),
    )(adj, h3, d_col, b_pad, w2_pad)


def _aggregate_final(adj, h3, d_col, b_pad, tm, tk):
    """out = d * (A+I) @ Hs2 + b2   -> f32 [npad, c2p]."""
    npad = adj.shape[0]
    kt, _, cp = h3.shape
    return pl.pallas_call(
        agg_final_kernel,
        out_shape=jax.ShapeDtypeStruct((npad, cp), jnp.float32),
        grid_spec=pltpu.PrefetchScalarGridSpec(
            num_scalar_prefetch=0,
            grid=(npad // tm, npad // tk),
            in_specs=[
                pl.BlockSpec((tm, tk), lambda i, k: (i, k)),
                pl.BlockSpec((kt, tk, cp), lambda i, k: (0, 0, 0)),   # Hs2 resident
                pl.BlockSpec((tm, 1), lambda i, k: (i, 0)),
                pl.BlockSpec((1, cp), lambda i, k: (0, 0)),
            ],
            out_specs=pl.BlockSpec((tm, cp), lambda i, k: (i, 0)),
            scratch_shapes=[pltpu.VMEM((tm, cp), jnp.float32)],
        ),
        compiler_params=pltpu.CompilerParams(
            dimension_semantics=("parallel", "arbitrary"),
            vmem_limit_bytes=VMEM_LIMIT,
        ),
        cost_estimate=pl.CostEstimate(
            flops=2 * npad * npad * cp,
            transcendentals=0,
            bytes_accessed=(npad * npad * 1
                            + npad * cp * 2
                            + npad * cp * 4
                            + npad * 4),
        ),
    )(adj, h3, d_col, b_pad)


def precompute_graph(edge_index, num_nodes, npad):
    """Dense (A+I) as int8 + d = deg^{-1/2}; built ONCE and reused across calls."""
    src, dst = edge_index[0], edge_index[1]
    adj = jnp.zeros((npad, npad), jnp.int8)
    adj = adj.at[src, dst].set(1)
    diag = jnp.arange(num_nodes)
    adj = adj.at[diag, diag].set(1)          # add_remaining_self_loops semantics
    deg = jnp.sum(adj, axis=1, dtype=jnp.float32)
    d_col = jnp.where(deg > 0.0, jax.lax.rsqrt(deg), 0.0)
    d_col = d_col.reshape(npad, 1).astype(jnp.float32)
    return adj, d_col


def encoder_forward(x, edge_index, params, *, graph=None):
    """Full 2-layer GCN encoder forward pass (3 pallas_calls)."""
    n, f = x.shape
    w1, b1, w2, b2 = params
    c1, c2 = w1.shape[1], w2.shape[1]

    npad, tm, tk = _plan_tiles(n)
    if graph is None:
        graph = precompute_graph(edge_index, n, npad)
    adj, d_col = graph

    fpad = _round_up(f, LANE)
    c1p = _round_up(c1, LANE)
    c2p = _round_up(c2, LANE)

    x_pad = jnp.zeros((npad, fpad), jnp.float32).at[:n, :f].set(x.astype(jnp.float32))
    w1_pad = jnp.zeros((fpad, c1p), jnp.float32).at[:f, :c1].set(w1)
    b1_pad = jnp.zeros((1, c1p), jnp.float32).at[0, :c1].set(b1)
    w2_pad = jnp.zeros((c1p, c2p), jnp.float32).at[:c1, :c2].set(w2)
    b2_pad = jnp.zeros((1, c2p), jnp.float32).at[0, :c2].set(b2)

    kt = npad // tk

    # (1) layer-1 transform:  Hs1 = d * (X @ W1)
    hs1 = _transform(x_pad, w1_pad, d_col, tm)
    hs1 = hs1.reshape(kt, tk, c1p)            # contiguous; no copy

    # (2) layer-1 aggregate fused with layer-2 transform:
    #     Hs2 = d * ((d * (A+I) @ Hs1 + b1) @ W2)
    hs2 = _aggregate_fused(adj, hs1, d_col, b1_pad, w2_pad, tm, tk)
    hs2 = hs2.reshape(kt, tk, c2p)

    # (3) layer-2 aggregate:  out = d * (A+I) @ Hs2 + b2
    out = _aggregate_final(adj, hs2, d_col, b2_pad, tm, tk)
    return out[:n, :c2]


# ------------------------------------------------------------- reference ---

def encoder_reference(x, edge_index, params):
    """Pure-JAX f32 reference with identical adjacency semantics."""
    n = x.shape[0]
    src, dst = edge_index[0], edge_index[1]
    a = jnp.zeros((n, n), jnp.float32).at[src, dst].set(1.0)
    diag = jnp.arange(n)
    a = a.at[diag, diag].set(1.0)
    deg = a.sum(axis=1)
    dis = jnp.where(deg > 0.0, jax.lax.rsqrt(deg), 0.0)
    adj = dis[:, None] * a * dis[None, :]
    w1, b1, w2, b2 = params
    h = adj @ (x @ w1) + b1
    h = adj @ (h @ w2) + b2
    return h


def init_params(key, layer_dims):
    """Deterministic glorot-uniform weights + zero biases (GCNConv shapes)."""
    params = []
    for i in range(len(layer_dims) - 1):
        fan_in, fan_out = layer_dims[i], layer_dims[i + 1]
        key, sub = jax.random.split(key)
        limit = jnp.sqrt(6.0 / (fan_in + fan_out))
        w = jax.random.uniform(sub, (fan_in, fan_out), jnp.float32, -limit, limit)
        b = jnp.zeros((fan_out,), jnp.float32)
        params.extend([w, b])
    return tuple(params)


if __name__ == "__main__":
    key = jax.random.PRNGKey(0)

    # Small synthetic "Planetoid-like" problem.
    num_nodes = 16
    num_features = 16
    channels = 8
    layer_dims = [num_features, channels, channels]   # as in the module

    key, kx = jax.random.split(key)
    x = jax.random.normal(kx, (num_nodes, num_features), jnp.float32)

    # Deterministic ring graph (bidirectional edges), shape [2, E].
    src = jnp.arange(num_nodes, dtype=jnp.int32)
    dst = (src + 1) % num_nodes
    edge_index = jnp.stack(
        [jnp.concatenate([src, dst]), jnp.concatenate([dst, src])], axis=0
    )

    params = init_params(key, layer_dims)

    # Graph structure built once and reused across forward calls (cached=True).
    npad, _, _ = _plan_tiles(num_nodes)
    graph = precompute_graph(edge_index, num_nodes, npad)

    out = encoder_forward(x, edge_index, params, graph=graph)
    out = jax.block_until_ready(out)

    ref = encoder_reference(x, edge_index, params)
    assert out.shape == (num_nodes, channels)
    # bf16 activation stream with f32 accumulation -> loosened tolerance.
    assert jnp.allclose(out, ref, atol=2e-2, rtol=2e-2), (
        float(jnp.max(jnp.abs(out - ref))))

    print("KERNEL_OK")
</pallas_src>

<mosaic_0001>
module attributes {stable_mosaic.version = 11 : i64} {
  func.func @transform_kernel(%arg0: i32, %arg1: memref<128x128xf32, #tpu.memory_space<vmem>>, %arg2: memref<128x128xf32, #tpu.memory_space<vmem>>, %arg3: memref<128x1xf32, #tpu.memory_space<vmem>>, %arg4: memref<128x128xbf16, #tpu.memory_space<vmem>>) attributes {dimension_semantics = [#tpu.dimension_semantics<parallel>], iteration_bounds = array<i64: 1>, scalar_prefetch = 0 : i64, scratch_operands = 0 : i64, tpu.core_type = #tpu.core_type<tc>, window_params = [{transform_indices = @transform_0, window_bounds = array<i64: 128, 128>}, {pipeline_mode = #tpu.pipeline_mode<synchronous>, transform_indices = @transform_1, window_bounds = array<i64: 128, 128>}, {transform_indices = @transform_2, window_bounds = array<i64: 128, 1>}, {transform_indices = @transform_3, window_bounds = array<i64: 128, 128>}]} {
    %c0 = arith.constant 0 : index
    %c0_0 = arith.constant 0 : index
    %0 = vector.load %arg1[%c0, %c0_0] : memref<128x128xf32, #tpu.memory_space<vmem>>, vector<128x128xf32>
    %c0_1 = arith.constant 0 : index
    %c0_2 = arith.constant 0 : index
    %1 = vector.load %arg2[%c0_1, %c0_2] : memref<128x128xf32, #tpu.memory_space<vmem>>, vector<128x128xf32>
    %cst = arith.constant dense<0.000000e+00> : vector<128x128xf32>
    %2 = tpu.matmul %0, %1, %cst {dimension_numbers = #tpu.dot_dimension_numbers<[1], [0], [0], [1], [0, 0, 1, 1], [], []>} : vector<128x128xf32>, vector<128x128xf32>, vector<128x128xf32> -> vector<128x128xf32>
    %c0_3 = arith.constant 0 : index
    %c0_4 = arith.constant 0 : index
    %3 = vector.load %arg3[%c0_3, %c0_4] : memref<128x1xf32, #tpu.memory_space<vmem>>, vector<128x1xf32>
    %4 = vector.broadcast %3 : vector<128x1xf32> to vector<128x128xf32>
    %5 = arith.mulf %4, %2 : vector<128x128xf32>
    %6 = arith.truncf %5 : vector<128x128xf32> to vector<128x128xbf16>
    %c0_5 = arith.constant 0 : index
    %c0_6 = arith.constant 0 : index
    %7 = vector.load %arg4[%c0_5, %c0_6] : memref<128x128xbf16, #tpu.memory_space<vmem>>, vector<128x128xbf16>
    tpu.vector_store %arg4[%c0_5, %c0_6], %6 {strides = array<i32>} : memref<128x128xbf16, #tpu.memory_space<vmem>>, vector<128x128xbf16>,
    return
  }
  func.func @transform_0(%arg0: i32) -> (i32, i32) {
    %c0_i32 = arith.constant 0 : i32
    %c0_i32_0 = arith.constant 0 : i32
    return %arg0, %c0_i32 : i32, i32
  }
  func.func @transform_1(%arg0: i32) -> (i32, i32) {
    %c0_i32 = arith.constant 0 : i32
    %c0_i32_0 = arith.constant 0 : i32
    %c0_i32_1 = arith.constant 0 : i32
    return %c0_i32, %c0_i32_0 : i32, i32
  }
  func.func @transform_2(%arg0: i32) -> (i32, i32) {
    %c0_i32 = arith.constant 0 : i32
    %c0_i32_0 = arith.constant 0 : i32
    return %arg0, %c0_i32 : i32, i32
  }
  func.func @transform_3(%arg0: i32) -> (i32, i32) {
    %c0_i32 = arith.constant 0 : i32
    %c0_i32_0 = arith.constant 0 : i32
    return %arg0, %c0_i32 : i32, i32
  }
}

</mosaic_0001>

<bundles_post_ra>
// kernel: tpu_custom_call.1
= control target key start
LH: loop header
LB: loop body
LE: loop exit
PB: predicated region body
PF: predicated region fallthrough
CT: control target
= control target key end

     0   :  { %8 = vsyncpa [#allocation3], 0  ;;  %s834_s0 = inlined_call_operand.vmem [shape: f32[128,128], index: 0, kind: input, shape index: {}]   ;;  %s835_s1 = inlined_call_operand.hbm [shape: f32[128,128], index: 1, kind: input, shape index: {}]   ;;  %s836_s2 = inlined_call_operand.vmem [shape: f32[128,1], index: 2, kind: input, shape index: {}]   ;;  %s837_s3 = inlined_call_operand.hbm [shape: bf16[128,128], index: 3, kind: output, shape index: {}]  }
   0x1   :  { %9 = vsyncpa [#allocation4], 0  ;;  %s687_s12 = smov [#allocation2]   ;;  %s639_s16 = scalar_lea.hbm %s835_s1, 2048 }
   0x2   :  { %s17_s13 = sshll.u32 %s687_s12, 4  ;;  %p640_p0 = scmp.ne.s32.totalorder %s835_s1, %s639_s16  ;;  %s18_s13 = int_to_ptr.vmem [resolvable:$true] %s17_s13 }
   0x3   :  { %p643_p1 = scmp.lt.u32.totalorder %s639_s16, %s835_s1 }
   0x5   :  { %p645_p2 = pnand %p643_p1, %p640_p0 }
   0x7   :  { %648 = shalt.err (!%p645_p2)
}
   0x8   :  { %s649_s21 = scalar_lea.vmem %s18_s13, 2048  ;;  %p654_p4 = scmp.lt.s32.totalorder %s18_s13, %s18_s13 }
   0x9   :  { %p650_p3 = scmp.ne.s32.totalorder %s18_s13, %s649_s21  ;;  %p655_p5 = scmp.lt.s32.totalorder %s649_s21, %s649_s21 }
   0xb   :  { %p656_p6 = por %p655_p5, %p654_p4 }
   0xd   :  { %p657_p7 = pnand %p656_p6, %p650_p3 }
   0xf   :  { %660 = shalt.err (!%p657_p7)
}
  0x10   :  { %s688_s22 = smov 128   ;;  %s689_s23 = smov 8  }
  0x11   :  { %23 = dma.hbm_to_vmem [thread:$0]  %s835_s1, 2048, %s18_s13, [#allocation3], %s688_s22, %s688_s22, %s689_s23  }
  0x12   :  { %683 = dma.done.wait [#allocation3], 2048  }
  0x13   :  { %684 = vsyncadd [#allocation3], 4294965248  ;;  %v690_v0 = vmov 0   ;;  %v45_v1 = vld [vmem:[#allocation2] sm:$0xff]  ;;  %v46_v2 = vld [vmem:[#allocation2 + $0x8] sm:$0xff] }
  0x14   :  { %638 = vset.pattern.permute.xlu1 %v690_v0  ;;  %637 = vset.pattern.permute.xlu0 %v690_v0  ;;  %v47_v3 = vld [vmem:[#allocation2 + $0x10] sm:$0xff]  ;;  %v582_v4 = vpack.c.bf16 %v46_v2, %v45_v1  ;;  %v48_v5 = vld [vmem:[#allocation2 + $0x18] sm:$0xff]  ;;  %v49_v7 = vld [vmem:[#allocation2 + $0x20] sm:$0xff] }
  0x15   :  { %v586_v6 = vpack.c.bf16 %v48_v5, %v47_v3  ;;  %v50_v8 = vld [vmem:[#allocation2 + $0x28] sm:$0xff]  ;;  %v29_v10 = vld [vmem:[%s834_s0] sm:$0xff]  ;;  %v51_v12 = vld [vmem:[#allocation2 + $0x30] sm:$0xff] }
  0x16   :  { %583 = vmatprep.subr.bf16.mxu0 %v582_v4  ;;  %614 = vmatprep.subr.bf16.mxu1 %v582_v4  ;;  %v590_v9 = vpack.c.bf16 %v50_v8, %v49_v7  ;;  %v37_v11 = vld [vmem:[%s834_s0 + $0x40] sm:$0xff]  ;;  %v52_v13 = vld [vmem:[#allocation2 + $0x38] sm:$0xff]  ;;  %v54_v16 = vld [vmem:[#allocation2 + $0x48] sm:$0xff] }
  0x17   :  { %585 = vmatpush3.bf16.msra.mxu0 %v582_v4  ;;  %622 = vmatpush3.bf16.msra.mxu1 %v582_v4  ;;  %v594_v14 = vpack.c.bf16 %v52_v13, %v51_v12  ;;  %v53_v15 = vld [vmem:[#allocation2 + $0x40] sm:$0xff]  ;;  %v208_v17 = vld [vmem:[%s836_s2 + $0x10] sm:$0xff]  ;;  %v209_v19 = vld [vmem:[%s836_s2 + $0x18] sm:$0xff] }
  0x18   :  { %587 = vmatprep.subr.bf16.mxu0 %v586_v6  ;;  %615 = vmatprep.subr.bf16.mxu1 %v586_v6  ;;  %v206_v18 = vld [vmem:[%s836_s2] sm:$0xff]  ;;  %v598_v20 = vpack.c.bf16 %v54_v16, %v53_v15  ;;  %v55_v21 = vld [vmem:[#allocation2 + $0x50] sm:$0xff]  ;;  %v56_v22 = vld [vmem:[#allocation2 + $0x58] sm:$0xff] }
  0x19   :  { %558 = vmatprep.mubr.f32.mxu0 %v29_v10  ;;  %570 = vmatprep.mubr.f32.mxu1 %v37_v11  ;;  %v207_v23 = vld [vmem:[%s836_s2 + $0x8] sm:$0xff]  ;;  %v602_v25 = vpack.c.bf16 %v56_v22, %v55_v21  ;;  %v57_v26 = vld [vmem:[#allocation2 + $0x60] sm:$0xff]  ;;  %v213_v29 = vld [vmem:[%s836_s2 + $0x38] sm:$0xff] }
  0x1a   :  { %234 = vperm.xlu1 %638, %v208_v17   ;;  %224 = vperm.xlu0 %637, %v206_v18   ;;  %v211_v24 = vld [vmem:[%s836_s2 + $0x28] sm:$0xff]  ;;  %v210_v28 = vld [vmem:[%s836_s2 + $0x20] sm:$0xff]  ;;  %v59_v31 = vld [vmem:[#allocation2 + $0x70] sm:$0xff] }
  0x1b   :  { %589 = vmatpush3.bf16.msra.mxu0 %v586_v6  ;;  %623 = vmatpush3.bf16.msra.mxu1 %v586_v6  ;;  %v58_v27 = vld [vmem:[#allocation2 + $0x68] sm:$0xff]  ;;  %v60_v32 = vld [vmem:[#allocation2 + $0x78] sm:$0xff]  ;;  %v212_v33 = vld [vmem:[%s836_s2 + $0x30] sm:$0xff] }
  0x1c   :  { %591 = vmatprep.subr.bf16.mxu0 %v590_v9  ;;  %616 = vmatprep.subr.bf16.mxu1 %v590_v9  ;;  %v606_v30 = vpack.c.bf16 %v58_v27, %v57_v26  ;;  %v215_v34 = vld [vmem:[%s836_s2 + $0x48] sm:$0xff]  ;;  %v610_v35 = vpack.c.bf16 %v60_v32, %v59_v31  ;;  %v214_v36 = vld [vmem:[%s836_s2 + $0x40] sm:$0xff]  ;;  %v217_v37 = vld [vmem:[%s836_s2 + $0x58] sm:$0xff] }
  0x1d   :  { %v216_v38 = vld [vmem:[%s836_s2 + $0x50] sm:$0xff]  ;;  %v30_v39 = vld [vmem:[%s834_s0 + $0x8] sm:$0xff]  ;;  %v218_v44 = vld [vmem:[%s836_s2 + $0x60] sm:$0xff] }
  0x1e   :  { %239 = vperm.xlu1 %638, %v209_v19   ;;  %229 = vperm.xlu0 %637, %v207_v23   ;;  %v38_v40 = vld [vmem:[%s834_s0 + $0x48] sm:$0xff]  ;;  %v31_v41 = vld [vmem:[%s834_s0 + $0x10] sm:$0xff]  ;;  %v32_v45 = vld [vmem:[%s834_s0 + $0x18] sm:$0xff] }
  0x1f   :  { %593 = vmatpush3.bf16.msra.mxu0 %v590_v9  ;;  %624 = vmatpush3.bf16.msra.mxu1 %v590_v9  ;;  %v39_v42 = vld [vmem:[%s834_s0 + $0x50] sm:$0xff]  ;;  %v219_v43 = vld [vmem:[%s836_s2 + $0x68] sm:$0xff]  ;;  %v40_v46 = vld [vmem:[%s834_s0 + $0x58] sm:$0xff] }
  0x20   :  { %595 = vmatprep.subr.bf16.mxu0 %v594_v14  ;;  %617 = vmatprep.subr.bf16.mxu1 %v594_v14  ;;  %v33_v47 = vld [vmem:[%s834_s0 + $0x20] sm:$0xff]  ;;  %v221_v49 = vld [vmem:[%s836_s2 + $0x78] sm:$0xff]  ;;  %v220_v50 = vld [vmem:[%s836_s2 + $0x70] sm:$0xff] }
  0x21   :  { %v41_v48 = vld [vmem:[%s834_s0 + $0x60] sm:$0xff]  ;;  %v34_v51 = vld [vmem:[%s834_s0 + $0x28] sm:$0xff]  ;;  %v35_v53 = vld [vmem:[%s834_s0 + $0x30] sm:$0xff] }
  0x22   :  { %249 = vperm.xlu1 %638, %v211_v24   ;;  %244 = vperm.xlu0 %637, %v210_v28   ;;  %v42_v52 = vld [vmem:[%s834_s0 + $0x68] sm:$0xff]  ;;  %v43_v54 = vld [vmem:[%s834_s0 + $0x70] sm:$0xff]  ;;  %v36_v55 = vld [vmem:[%s834_s0 + $0x38] sm:$0xff] }
  0x23   :  { %597 = vmatpush3.bf16.msra.mxu0 %v594_v14  ;;  %625 = vmatpush3.bf16.msra.mxu1 %v594_v14  ;;  %v44_v56 = vld [vmem:[%s834_s0 + $0x78] sm:$0xff]  ;;  %s691_s0 = smov [#allocation5]  }
  0x24   :  { %599 = vmatprep.subr.bf16.mxu0 %v598_v20  ;;  %618 = vmatprep.subr.bf16.mxu1 %v598_v20  ;;  %s403_s5 = sshll.u32 %s691_s0, 4  ;;  %s404_s5 = int_to_ptr.vmem [resolvable:$true] %s403_s5 }
  0x25   :  { %s661_s6 = scalar_lea.vmem %s404_s5, 1024  ;;  %p666_p9 = scmp.lt.s32.totalorder %s404_s5, %s404_s5 }
  0x26   :  { %259 = vperm.xlu1 %638, %v213_v29   ;;  %254 = vperm.xlu0 %637, %v212_v33   ;;  %p662_p8 = scmp.ne.s32.totalorder %s404_s5, %s661_s6  ;;  %p667_p10 = scmp.lt.s32.totalorder %s661_s6, %s661_s6 }
  0x27   :  { %601 = vmatpush3.bf16.msra.mxu0 %v598_v20  ;;  %626 = vmatpush3.bf16.msra.mxu1 %v598_v20 }
  0x28   :  { %603 = vmatprep.subr.bf16.mxu0 %v602_v25  ;;  %619 = vmatprep.subr.bf16.mxu1 %v602_v25  ;;  %p668_p11 = por %p667_p10, %p666_p9 }
  0x2a   :  { %269 = vperm.xlu1 %638, %v215_v34   ;;  %264 = vperm.xlu0 %637, %v214_v36   ;;  %p669_p12 = pnand %p668_p11, %p662_p8 }
  0x2b   :  { %605 = vmatpush3.bf16.msra.mxu0 %v602_v25  ;;  %627 = vmatpush3.bf16.msra.mxu1 %v602_v25 }
  0x2c   :  { %607 = vmatprep.subr.bf16.mxu0 %v606_v30  ;;  %620 = vmatprep.subr.bf16.mxu1 %v606_v30 }
  0x2e   :  { %279 = vperm.xlu1 %638, %v217_v37   ;;  %274 = vperm.xlu0 %637, %v216_v38  }
  0x2f   :  { %609 = vmatpush3.bf16.msra.mxu0 %v606_v30  ;;  %628 = vmatpush3.bf16.msra.mxu1 %v606_v30 }
  0x30   :  { %611 = vmatprep.subr.bf16.mxu0 %v610_v35  ;;  %621 = vmatprep.subr.bf16.mxu1 %v610_v35 }
  0x32   :  { %289 = vperm.xlu1 %638, %v219_v43   ;;  %284 = vperm.xlu0 %637, %v218_v44  }
  0x33   :  { %613 = vmatpush3.bf16.msra.mxu0 %v610_v35  ;;  %629 = vmatpush3.bf16.msra.mxu1 %v610_v35 }
  0x36   :  { %559 = vmatmul.mubr.f32.vlgmr.msra.gmra.mrb[0].mxu0 %v30_v39  ;;  %571 = vmatmul.mubr.f32.vlgmr.msra.gmra.mrb[0].mxu1 %v38_v40 }
  0x37   :  { %561 = vmatprep.mubr.f32.mxu0 %v31_v41  ;;  %573 = vmatprep.mubr.f32.mxu1 %v39_v42 }
  0x38   :  { %299 = vperm.xlu1 %638, %v221_v49   ;;  %294 = vperm.xlu0 %637, %v220_v50  }
  0x3a   :  { %562 = vmatmul.mubr.f32.gmra.mrb[2].mxu0 %v32_v45  ;;  %574 = vmatmul.mubr.f32.gmra.mrb[2].mxu1 %v40_v46 }
  0x3b   :  { %564 = vmatprep.mubr.f32.mxu0 %v33_v47  ;;  %576 = vmatprep.mubr.f32.mxu1 %v41_v48 }
  0x3e   :  { %565 = vmatmul.mubr.f32.gmra.mrb[4].mxu0 %v34_v51  ;;  %577 = vmatmul.mubr.f32.gmra.mrb[4].mxu1 %v42_v52 }
  0x3f   :  { %567 = vmatprep.mubr.f32.mxu0 %v35_v53  ;;  %579 = vmatprep.mubr.f32.mxu1 %v43_v54 }
  0x42   :  { %568 = vmatmul.mubr.f32.gmra.mrb[6].mxu0 %v36_v55  ;;  %580 = vmatmul.mubr.f32.gmra.mrb[6].mxu1 %v44_v56 }
  0x99   :  { %v235_v57 = vpop.permute.xlu1 %234  ;;  %v225_v58 = vpop.permute.xlu0 %224 }
  0x9d   :  { %v240_v59 = vpop.permute.xlu1 %239  ;;  %v230_v60 = vpop.permute.xlu0 %229 }
  0xa1   :  { %v250_v61 = vpop.permute.xlu1 %249  ;;  %v245_v62 = vpop.permute.xlu0 %244 }
  0xa5   :  { %v260_v63 = vpop.permute.xlu1 %259  ;;  %v255_v0 = vpop.permute.xlu0 %254 }
  0xa9   :  { %v270_v1 = vpop.permute.xlu1 %269  ;;  %v265_v2 = vpop.permute.xlu0 %264 }
  0xad   :  { %v280_v3 = vpop.permute.xlu1 %279  ;;  %v275_v4 = vpop.permute.xlu0 %274 }
  0xb1   :  { %v290_v13 = vpop.permute.xlu1 %289  ;;  %v285_v14 = vpop.permute.xlu0 %284 }
  0xb7   :  { %v300_v35 = vpop.permute.xlu1 %299  ;;  %v295_v36 = vpop.permute.xlu0 %294 }
 0x109   :  { %v560_v5 = vpop.f32.mrb[0].mxu0  ;;  %v572_v6 = vpop.f32.mrb[0].mxu1 }
 0x10a   :  { %v303_v7 = vmul.f32 %v560_v5, %v230_v60  ;;  %v311_v8 = vmul.f32 %v572_v6, %v270_v1  ;;  %v127_v9 = vpop.f32.mrb[1].mxu0  ;;  %v167_v10 = vpop.f32.mrb[1].mxu1 }
 0x10b   :  { %v302_v11 = vmul.f32 %v225_v58, %v127_v9  ;;  %v310_v12 = vmul.f32 %v265_v2, %v167_v10 }
 0x10d   :  { %v450_v15 = vpack.c.bf16 %v303_v7, %v302_v11  ;;  %v470_v16 = vpack.c.bf16 %v311_v8, %v310_v12  ;;  %v563_v17 = vpop.f32.mrb[2].mxu0  ;;  %v575_v18 = vpop.f32.mrb[2].mxu1 }
 0x10e   :  { %v305_v19 = vmul.f32 %v563_v17, %v240_v59  ;;  %v313_v20 = vmul.f32 %v575_v18, %v280_v3  ;;  %v137_v21 = vpop.f32.mrb[3].mxu0  ;;  %v177_v22 = vpop.f32.mrb[3].mxu1 }
 0x10f   :  { %451 = vst [vmem:[#allocation5] sm:$0xff] %v450_v15   ;;  %490 = vst [vmem:[#allocation5 + $0x20] sm:$0xff] %v470_v16   ;;  %v304_v23 = vmul.f32 %v235_v57, %v137_v21  ;;  %v312_v24 = vmul.f32 %v275_v4, %v177_v22 }
 0x111   :  { %v455_v25 = vpack.c.bf16 %v305_v19, %v304_v23  ;;  %v475_v26 = vpack.c.bf16 %v313_v20, %v312_v24  ;;  %v566_v27 = vpop.f32.mrb[4].mxu0  ;;  %v578_v28 = vpop.f32.mrb[4].mxu1 }
 0x112   :  { %v307_v29 = vmul.f32 %v566_v27, %v250_v61  ;;  %v315_v30 = vmul.f32 %v578_v28, %v290_v13  ;;  %v147_v31 = vpop.f32.mrb[5].mxu0  ;;  %v187_v32 = vpop.f32.mrb[5].mxu1 }
 0x113   :  { %487 = vst [vmem:[#allocation5 + $0x8] sm:$0xff] %v455_v25   ;;  %491 = vst [vmem:[#allocation5 + $0x28] sm:$0xff] %v475_v26   ;;  %v306_v33 = vmul.f32 %v245_v62, %v147_v31  ;;  %v314_v34 = vmul.f32 %v285_v14, %v187_v32 }
 0x115   :  { %v460_v37 = vpack.c.bf16 %v307_v29, %v306_v33  ;;  %v480_v38 = vpack.c.bf16 %v315_v30, %v314_v34  ;;  %v569_v39 = vpop.f32.mrb[6].mxu0  ;;  %v581_v40 = vpop.f32.mrb[6].mxu1 }
 0x116   :  { %v309_v41 = vmul.f32 %v569_v39, %v260_v63  ;;  %v317_v42 = vmul.f32 %v581_v40, %v300_v35  ;;  %v157_v43 = vpop.f32.mrb[7].mxu0  ;;  %v197_v44 = vpop.f32.mrb[7].mxu1 }
 0x117   :  { %488 = vst [vmem:[#allocation5 + $0x10] sm:$0xff] %v460_v37   ;;  %492 = vst [vmem:[#allocation5 + $0x30] sm:$0xff] %v480_v38   ;;  %v308_v45 = vmul.f32 %v255_v0, %v157_v43  ;;  %v316_v46 = vmul.f32 %v295_v36, %v197_v44 }
 0x119   :  { %v465_v47 = vpack.c.bf16 %v309_v41, %v308_v45  ;;  %v485_v48 = vpack.c.bf16 %v317_v42, %v316_v46 }
 0x11b   :  { %489 = vst [vmem:[#allocation5 + $0x18] sm:$0xff] %v465_v47   ;;  %493 = vst [vmem:[#allocation5 + $0x38] sm:$0xff] %v485_v48  }
 0x11c   :  { %672 = shalt.err (!%p669_p12)
}
 0x11d   :  { %s673_s9 = scalar_lea.hbm %s837_s3, 1024 }
 0x11e   :  { %p674_p13 = scmp.ne.s32.totalorder %s837_s3, %s673_s9  ;;  %p677_p0 = scmp.lt.u32.totalorder %s673_s9, %s837_s3 }
 0x120   :  { %p679_p1 = pnand %p677_p0, %p674_p13 }
 0x122   :  { %682 = shalt.err (!%p679_p1)
}
 0x123   :  { %s692_s14 = smov 64   ;;  %s693_s15 = smov 4  }
 0x124   :  { %409 = dma.vmem_to_hbm [thread:$0]  %s404_s5, 1024, %s837_s3, [#allocation4], %s692_s14, %s692_s14, %s693_s15  }
 0x125   :  { %685 = dma.done.wait [#allocation4], 1024  }
 0x126   :  { %686 = vsyncadd [#allocation4], 4294966272 }
 0x127   :  { %413 = vsyncpa [#allocation3], 1 }
 0x128   :  { %414 = vsyncpa [#allocation4], 1 }

</bundles_post_ra>
